<compile_context>
chip_gen: v6e
topology: v6e:2x2x1
jax: 0.10.0
libtpu: 0.0.40
codegen_flags: <defaults>
</compile_context>

<pallas_src>
import numpy as np
import jax
import jax.numpy as jnp
from jax.experimental import pallas as pl
from jax.experimental.pallas import tpu as pltpu


def _round_up(x, m):
    return ((x + m - 1) // m) * m


def _make_mlp_kernel(n_layers):
    """Fused MLP kernel. refs = (x, w_0..w_{L-1}, b_0..b_{L-1}, out).

    Weights are pre-transposed to (in_features, out_features) so each layer is
    a plain MXU matmul with no in-kernel transpose. All math in f32.
    """

    def kernel(*refs):
        x_ref = refs[0]
        w_refs = refs[1:1 + n_layers]
        b_refs = refs[1 + n_layers:1 + 2 * n_layers]
        o_ref = refs[-1]

        h = x_ref[...].astype(jnp.float32)
        for li in range(n_layers):
            h = jnp.dot(h, w_refs[li][...].astype(jnp.float32),
                        preferred_element_type=jnp.float32)
            h = h + b_refs[li][...]           # (1, out) broadcasts over rows
            if li < n_layers - 1:             # hidden layers: ReLU
                h = jnp.maximum(h, 0.0)
        o_ref[...] = h.astype(o_ref.dtype)

    return kernel


def linear_net_pallas(x, weights, biases, *, block_rows=512):
    """LinearNet.forward(x).

    x:        (B, l_in)
    weights:  list of (out_features, in_features) arrays (torch nn.Linear layout)
    biases:   list of (out_features,) arrays
    Returns y.squeeze(1): (B,) if l_out == 1 else (B, l_out).
    """
    n_layers = len(weights)
    assert n_layers >= 1 and len(biases) == n_layers
    B, l_in = x.shape
    l_out = int(weights[-1].shape[0])
    dtype = x.dtype

    # Sublane packing of the row (second-minor) axis by element size.
    sub = {4: 8, 2: 16, 1: 32}.get(jnp.dtype(dtype).itemsize, 8)

    # ---- pad every feature dim up to a multiple of 128 (lane-dense I/O) ----
    feat = [l_in] + [int(w.shape[0]) for w in weights]
    feat_p = [_round_up(f, 128) for f in feat]

    x_p = x
    if feat_p[0] != feat[0]:
        x_p = jnp.pad(x_p, ((0, 0), (0, feat_p[0] - feat[0])))

    w_p, b_p = [], []
    for li, (w, b) in enumerate(zip(weights, biases)):
        wt = jnp.transpose(w)                       # (in_f, out_f)
        wt = jnp.pad(wt, ((0, feat_p[li] - wt.shape[0]),
                          (0, feat_p[li + 1] - wt.shape[1])))
        w_p.append(wt.astype(dtype))
        bb = jnp.pad(b, (0, feat_p[li + 1] - b.shape[0]))
        b_p.append(bb.reshape(1, feat_p[li + 1]).astype(jnp.float32))

    # ---- pad batch only up to the row tile ---------------------------------
    tm = min(_round_up(block_rows, sub), _round_up(max(B, 1), sub))
    B_p = _round_up(max(B, 1), tm)
    if B_p != B:
        x_p = jnp.pad(x_p, ((0, B_p - B), (0, 0)))

    grid = (B_p // tm,)

    in_specs = [pl.BlockSpec((tm, feat_p[0]), lambda i: (i, 0))]
    for li in range(n_layers):                       # weights: resident blocks
        in_specs.append(
            pl.BlockSpec((feat_p[li], feat_p[li + 1]), lambda i: (0, 0)))
    for li in range(n_layers):                       # biases: resident blocks
        in_specs.append(pl.BlockSpec((1, feat_p[li + 1]), lambda i: (0, 0)))
    out_spec = pl.BlockSpec((tm, feat_p[-1]), lambda i: (i, 0))

    # ---- cost estimate + explicit VMEM budget ------------------------------
    flops = 2 * B_p * sum(feat_p[li] * feat_p[li + 1] for li in range(n_layers))
    bytes_accessed = (
        B_p * feat_p[0] * jnp.dtype(dtype).itemsize
        + B_p * feat_p[-1] * jnp.dtype(dtype).itemsize
        + sum(int(np.prod(w.shape)) * w.dtype.itemsize for w in w_p)
        + sum(int(np.prod(b.shape)) * b.dtype.itemsize for b in b_p))
    cost = pl.CostEstimate(flops=int(flops), transcendentals=0,
                           bytes_accessed=int(bytes_accessed))

    out_p = pl.pallas_call(
        _make_mlp_kernel(n_layers),
        out_shape=jax.ShapeDtypeStruct((B_p, feat_p[-1]), dtype),
        grid_spec=pltpu.PrefetchScalarGridSpec(
            num_scalar_prefetch=0,
            grid=grid,
            in_specs=in_specs,
            out_specs=out_spec,
        ),
        compiler_params=pltpu.CompilerParams(
            dimension_semantics=("parallel",),   # rows independent -> megacore
            vmem_limit_bytes=32 * 1024 * 1024,   # safe on v5e/v6e/v7x
        ),
        cost_estimate=cost,
    )(x_p, *w_p, *b_p)

    y = out_p[:B, :l_out]
    # torch: y.squeeze(1) -- removes dim 1 only when l_out == 1.
    return jnp.squeeze(y, axis=1) if l_out == 1 else y


if __name__ == "__main__":
    key = jax.random.PRNGKey(0)

    # LinearNet(l_in=32, l_h=256, l_out=1, n_l=2) default configuration.
    B, l_in, l_h, l_out = 2, 32, 256, 1
    k0, k1, k2, k3, k4, k5, k6, k7 = jax.random.split(key, 8)

    x = jax.random.normal(k0, (B, l_in), dtype=jnp.float32)

    def init_linear(kw, kb, fan_in, fan_out):
        # matches torch.nn.Linear default init: U(-1/sqrt(fan_in), 1/sqrt(fan_in))
        lim = 1.0 / np.sqrt(fan_in)
        w = jax.random.uniform(kw, (fan_out, fan_in), jnp.float32, -lim, lim)
        b = jax.random.uniform(kb, (fan_out,), jnp.float32, -lim, lim)
        return w, b

    w1, b1 = init_linear(k1, k2, l_in, l_h)       # Linear(l_in, l_h)
    w2, b2 = init_linear(k3, k4, l_h, l_out)      # Linear(l_h, l_out)

    out = jax.block_until_ready(linear_net_pallas(x, [w1, w2], [b1, b2]))

    # NumPy reference of the PyTorch forward (n_l=2).
    xn = np.asarray(x)
    h = np.maximum(xn @ np.asarray(w1).T + np.asarray(b1), 0.0)
    ref = np.squeeze(h @ np.asarray(w2).T + np.asarray(b2), axis=1)
    assert out.shape == ref.shape and out.dtype == x.dtype
    np.testing.assert_allclose(np.asarray(out), ref, atol=1e-4, rtol=1e-4)

    # Deeper config (n_l=3) exercises the fused hidden-layer chain.
    w3, b3 = init_linear(k5, k6, l_h, l_h)        # extra Linear(l_h, l_h)
    out3 = jax.block_until_ready(
        linear_net_pallas(x, [w1, w3, w2], [b1, b3, b2]))
    h2 = np.maximum(h @ np.asarray(w3).T + np.asarray(b3), 0.0)
    ref3 = np.squeeze(h2 @ np.asarray(w2).T + np.asarray(b2), axis=1)
    np.testing.assert_allclose(np.asarray(out3), ref3, atol=1e-4, rtol=1e-4)

    # Multi-tile grid check: several row tiles, weights stay resident.
    Bm = 384
    xm = jax.random.normal(k7, (Bm, l_in), dtype=jnp.float32)
    outm = jax.block_until_ready(
        linear_net_pallas(xm, [w1, w2], [b1, b2], block_rows=128))
    hm = np.maximum(np.asarray(xm) @ np.asarray(w1).T + np.asarray(b1), 0.0)
    refm = np.squeeze(hm @ np.asarray(w2).T + np.asarray(b2), axis=1)
    np.testing.assert_allclose(np.asarray(outm), refm, atol=1e-4, rtol=1e-4)

    print("KERNEL_OK")
</pallas_src>

<mosaic_0001>
module attributes {stable_mosaic.version = 11 : i64} {
  func.func @kernel(%arg0: i32, %arg1: memref<8x128xf32, #tpu.memory_space<vmem>>, %arg2: memref<128x256xf32, #tpu.memory_space<vmem>>, %arg3: memref<256x128xf32, #tpu.memory_space<vmem>>, %arg4: memref<1x256xf32, #tpu.memory_space<vmem>>, %arg5: memref<1x128xf32, #tpu.memory_space<vmem>>, %arg6: memref<8x128xf32, #tpu.memory_space<vmem>>) attributes {dimension_semantics = [#tpu.dimension_semantics<parallel>], iteration_bounds = array<i64: 1>, scalar_prefetch = 0 : i64, scratch_operands = 0 : i64, tpu.core_type = #tpu.core_type<tc>, window_params = [{transform_indices = @transform_0, window_bounds = array<i64: 8, 128>}, {pipeline_mode = #tpu.pipeline_mode<synchronous>, transform_indices = @transform_1, window_bounds = array<i64: 128, 256>}, {pipeline_mode = #tpu.pipeline_mode<synchronous>, transform_indices = @transform_2, window_bounds = array<i64: 256, 128>}, {pipeline_mode = #tpu.pipeline_mode<synchronous>, transform_indices = @transform_3, window_bounds = array<i64: 1, 256>}, {pipeline_mode = #tpu.pipeline_mode<synchronous>, transform_indices = @transform_4, window_bounds = array<i64: 1, 128>}, {transform_indices = @transform_5, window_bounds = array<i64: 8, 128>}]} {
    %c0 = arith.constant 0 : index
    %c0_0 = arith.constant 0 : index
    %0 = vector.load %arg1[%c0, %c0_0] : memref<8x128xf32, #tpu.memory_space<vmem>>, vector<8x128xf32>
    %c0_1 = arith.constant 0 : index
    %c0_2 = arith.constant 0 : index
    %1 = vector.load %arg2[%c0_1, %c0_2] : memref<128x256xf32, #tpu.memory_space<vmem>>, vector<128x256xf32>
    %cst = arith.constant dense<0.000000e+00> : vector<8x256xf32>
    %2 = tpu.matmul %0, %1, %cst {dimension_numbers = #tpu.dot_dimension_numbers<[1], [0], [0], [1], [0, 0, 1, 1], [], []>} : vector<8x128xf32>, vector<128x256xf32>, vector<8x256xf32> -> vector<8x256xf32>
    %c0_3 = arith.constant 0 : index
    %c0_4 = arith.constant 0 : index
    %3 = vector.load %arg4[%c0_3, %c0_4] : memref<1x256xf32, #tpu.memory_space<vmem>>, vector<1x256xf32>
    %4 = vector.broadcast %3 : vector<1x256xf32> to vector<8x256xf32>
    %5 = arith.addf %2, %4 : vector<8x256xf32>
    %cst_5 = arith.constant 0.000000e+00 : f32
    %6 = vector.broadcast %cst_5 : f32 to vector<8x256xf32>
    %7 = arith.maximumf %5, %6 : vector<8x256xf32>
    %c0_6 = arith.constant 0 : index
    %c0_7 = arith.constant 0 : index
    %8 = vector.load %arg3[%c0_6, %c0_7] : memref<256x128xf32, #tpu.memory_space<vmem>>, vector<256x128xf32>
    %cst_8 = arith.constant dense<0.000000e+00> : vector<8x128xf32>
    %9 = tpu.matmul %7, %8, %cst_8 {dimension_numbers = #tpu.dot_dimension_numbers<[1], [0], [0], [1], [0, 0, 1, 1], [], []>} : vector<8x256xf32>, vector<256x128xf32>, vector<8x128xf32> -> vector<8x128xf32>
    %c0_9 = arith.constant 0 : index
    %c0_10 = arith.constant 0 : index
    %10 = vector.load %arg5[%c0_9, %c0_10] : memref<1x128xf32, #tpu.memory_space<vmem>>, vector<1x128xf32>
    %11 = vector.broadcast %10 : vector<1x128xf32> to vector<8x128xf32>
    %12 = arith.addf %9, %11 : vector<8x128xf32>
    %c0_11 = arith.constant 0 : index
    %c0_12 = arith.constant 0 : index
    %13 = vector.load %arg6[%c0_11, %c0_12] : memref<8x128xf32, #tpu.memory_space<vmem>>, vector<8x128xf32>
    tpu.vector_store %arg6[%c0_11, %c0_12], %12 {strides = array<i32>} : memref<8x128xf32, #tpu.memory_space<vmem>>, vector<8x128xf32>,
    return
  }
  func.func @transform_0(%arg0: i32) -> (i32, i32) {
    %c0_i32 = arith.constant 0 : i32
    %c0_i32_0 = arith.constant 0 : i32
    return %arg0, %c0_i32 : i32, i32
  }
  func.func @transform_1(%arg0: i32) -> (i32, i32) {
    %c0_i32 = arith.constant 0 : i32
    %c0_i32_0 = arith.constant 0 : i32
    %c0_i32_1 = arith.constant 0 : i32
    return %c0_i32, %c0_i32_0 : i32, i32
  }
  func.func @transform_2(%arg0: i32) -> (i32, i32) {
    %c0_i32 = arith.constant 0 : i32
    %c0_i32_0 = arith.constant 0 : i32
    %c0_i32_1 = arith.constant 0 : i32
    return %c0_i32, %c0_i32_0 : i32, i32
  }
  func.func @transform_3(%arg0: i32) -> (i32, i32) {
    %c0_i32 = arith.constant 0 : i32
    %c0_i32_0 = arith.constant 0 : i32
    %c0_i32_1 = arith.constant 0 : i32
    return %c0_i32, %c0_i32_0 : i32, i32
  }
  func.func @transform_4(%arg0: i32) -> (i32, i32) {
    %c0_i32 = arith.constant 0 : i32
    %c0_i32_0 = arith.constant 0 : i32
    %c0_i32_1 = arith.constant 0 : i32
    return %c0_i32, %c0_i32_0 : i32, i32
  }
  func.func @transform_5(%arg0: i32) -> (i32, i32) {
    %c0_i32 = arith.constant 0 : i32
    %c0_i32_0 = arith.constant 0 : i32
    return %arg0, %c0_i32 : i32, i32
  }
}

</mosaic_0001>

<bundles_post_ra>
// kernel: tpu_custom_call.1
= control target key start
LH: loop header
LB: loop body
LE: loop exit
PB: predicated region body
PF: predicated region fallthrough
CT: control target
= control target key end

     0   :  { %10 = vsyncpa [#allocation3], 0  ;;  %s492_s0 = inlined_call_operand.hbm [shape: f32[8,128], index: 0, kind: input, shape index: {}]   ;;  %s493_s1 = inlined_call_operand.hbm [shape: f32[128,256], index: 1, kind: input, shape index: {}]   ;;  %s494_s2 = inlined_call_operand.hbm [shape: f32[256,128], index: 2, kind: input, shape index: {}]   ;;  %s495_s3 = inlined_call_operand.vmem [shape: f32[1,256], index: 3, kind: input, shape index: {}]   ;;  %s496_s4 = inlined_call_operand.vmem [shape: f32[1,128], index: 4, kind: input, shape index: {}]   ;;  %s497_s5 = inlined_call_operand.hbm [shape: f32[8,128], index: 5, kind: output, shape index: {}]  }
   0x1   :  { %11 = vsyncpa [#allocation6], 0 }
   0x2   :  { %12 = vsyncpa [#allocation4], 0  ;;  %s435_s18 = smov [#allocation5]  }
   0x3   :  { %s28_s19 = sshll.u32 %s435_s18, 4  ;;  %s29_s19 = int_to_ptr.vmem [resolvable:$true] %s28_s19 }
   0x4   :  { %s357_s20 = scalar_lea.vmem %s29_s19, 4096  ;;  %p362_p1 = scmp.lt.s32.totalorder %s29_s19, %s29_s19 }
   0x5   :  { %p358_p0 = scmp.ne.s32.totalorder %s29_s19, %s357_s20  ;;  %p363_p2 = scmp.lt.s32.totalorder %s357_s20, %s357_s20 }
   0x7   :  { %p364_p3 = por %p363_p2, %p362_p1 }
   0x9   :  { %p365_p4 = pnand %p364_p3, %p358_p0 }
   0xb   :  { %368 = shalt.err (!%p365_p4)
}
   0xc   :  { %s436_s21 = smov 256   ;;  %s437_s22 = smov 16  }
   0xd   :  { %34 = dma.hbm_to_vmem [thread:$0]  %s493_s1, 4096, %s29_s19, [#allocation6], %s436_s21, %s436_s21, %s437_s22  }
   0xe   :  { %s438_s25 = smov [#allocation2]   ;;  %s439_s27 = smov [#allocation7]  }
   0xf   :  { %s19_s26 = sshll.u32 %s438_s25, 4  ;;  %s40_s28 = sshll.u32 %s439_s27, 4  ;;  %s20_s26 = int_to_ptr.vmem [resolvable:$true] %s19_s26  ;;  %s41_s28 = int_to_ptr.vmem [resolvable:$true] %s40_s28 }
  0x10   :  { %s377_s29 = scalar_lea.vmem %s20_s26, 128  ;;  %p382_p6 = scmp.lt.s32.totalorder %s20_s26, %s20_s26 }
  0x11   :  { %p378_p5 = scmp.ne.s32.totalorder %s20_s26, %s377_s29  ;;  %p383_p7 = scmp.lt.s32.totalorder %s377_s29, %s377_s29 }
  0x13   :  { %p384_p8 = por %p383_p7, %p382_p6 }
  0x15   :  { %p385_p9 = pnand %p384_p8, %p378_p5 }
  0x17   :  { %388 = shalt.err (!%p385_p9)
}
  0x18   :  { %22 = dma.hbm_to_vmem [thread:$0]  %s492_s0, 128, %s20_s26, [#allocation3]  }
  0x19   :  { %s397_s7 = scalar_lea.vmem %s41_s28, 4096  ;;  %p402_p11 = scmp.lt.s32.totalorder %s41_s28, %s41_s28 }
  0x1a   :  { %p398_p10 = scmp.ne.s32.totalorder %s41_s28, %s397_s7  ;;  %p403_p12 = scmp.lt.s32.totalorder %s397_s7, %s397_s7 }
  0x1c   :  { %p404_p13 = por %p403_p12, %p402_p11 }
  0x1e   :  { %p405_p0 = pnand %p404_p13, %p398_p10 }
  0x20   :  { %408 = shalt.err (!%p405_p0)
}
  0x21   :  { %s440_s1 = smov 128   ;;  %s441_s8 = smov 8  }
  0x22   :  { %46 = dma.hbm_to_vmem [thread:$0]  %s494_s2, 4096, %s41_s28, [#allocation6], %s440_s1, %s440_s1, %s441_s8  }
  0x23   :  { %429 = dma.done.wait [#allocation3], 128  }
  0x24   :  { %430 = vsyncadd [#allocation3], 4294967168 }
  0x25   :  { %431 = dma.done.wait [#allocation6], 8192  }
  0x26   :  { %432 = vsyncadd [#allocation6], 4294959104  ;;  %v442_v0 = vmov 0.0   ;;  %v92_v1 = vld [vmem:[#allocation5 + $0xf8] sm:$0xff]  ;;  %v91_v2 = vld [vmem:[#allocation5 + $0xf0] sm:$0xff]  ;;  %s443_s13 = smov [#allocation8]  }
  0x27   :  { %169 = vmatprep.mubr.f32.mxu0 %v442_v0  ;;  %v90_v3 = vld [vmem:[#allocation5 + $0xe8] sm:$0xff]  ;;  %105 = vmatprep.subr.mxu0 %v92_v1  ;;  %v89_v4 = vld [vmem:[#allocation5 + $0xe0] sm:$0xff]  ;;  %v88_v5 = vld [vmem:[#allocation5 + $0xd8] sm:$0xff]  ;;  %s294_s14 = sshll.u32 %s443_s13, 4  ;;  %s295_s14 = int_to_ptr.vmem [resolvable:$true] %s294_s14 }
  0x28   :  { %106 = vmatpush1.msra.mxu0 %v91_v2  ;;  %v87_v6 = vld [vmem:[#allocation5 + $0xd0] sm:$0xff]  ;;  %v86_v7 = vld [vmem:[#allocation5 + $0xc8] sm:$0xff]  ;;  %v85_v8 = vld [vmem:[#allocation5 + $0xc0] sm:$0xff]  ;;  %v95_v2 = vlaneseq  ;;  %p414_p2 = scmp.lt.s32.totalorder %s295_s14, %s295_s14 }
  0x29   :  { %107 = vmatprep.subr.mxu0 %v90_v3  ;;  %v84_v9 = vld [vmem:[#allocation5 + $0xb8] sm:$0xff]  ;;  %v83_v10 = vld [vmem:[#allocation5 + $0xb0] sm:$0xff]  ;;  %v82_v11 = vld [vmem:[#allocation5 + $0xa8] sm:$0xff] }
  0x2a   :  { %108 = vmatpush1.msra.mxu0 %v89_v4  ;;  %v81_v12 = vld [vmem:[#allocation5 + $0xa0] sm:$0xff]  ;;  %v80_v13 = vld [vmem:[#allocation5 + $0x98] sm:$0xff]  ;;  %v79_v14 = vld [vmem:[#allocation5 + $0x90] sm:$0xff]  ;;  %v96_v3 = vshrl.u32 %v95_v2, 7 }
  0x2b   :  { %109 = vmatprep.subr.mxu0 %v88_v5  ;;  %v209_v15 = vld [vmem:[#allocation7 + $0xf8] sm:$0xff]  ;;  %v208_v17 = vld [vmem:[#allocation7 + $0xf0] sm:$0xff]  ;;  %v78_v18 = vld [vmem:[#allocation5 + $0x88] sm:$0xff] }
  0x2c   :  { %110 = vmatpush1.msra.mxu0 %v87_v6  ;;  %v193_v16 = vld [vmem:[#allocation7 + $0x78] sm:$0xff]  ;;  %305 = vmatprep.subr.mxu1 %v209_v15  ;;  %v192_v19 = vld [vmem:[#allocation7 + $0x70] sm:$0xff]  ;;  %v77_v20 = vld [vmem:[#allocation5 + $0x80] sm:$0xff]  ;;  %v97_v4 = vsub.s32 0, %v96_v3  ;;  %v101_v6 = vsub.s32 1, %v96_v3 }
  0x2d   :  { %111 = vmatprep.subr.mxu0 %v86_v7  ;;  %306 = vmatpush3.msra.mxu1 %v193_v16  ;;  %v207_v21 = vld [vmem:[#allocation7 + $0xe8] sm:$0xff]  ;;  %v76_v22 = vld [vmem:[#allocation5 + $0x78] sm:$0xff]  ;;  %v75_v24 = vld [vmem:[#allocation5 + $0x70] sm:$0xff] }
  0x2e   :  { %112 = vmatpush1.msra.mxu0 %v85_v8  ;;  %307 = vmatprep.subr.mxu1 %v208_v17  ;;  %v191_v23 = vld [vmem:[#allocation7 + $0x68] sm:$0xff]  ;;  %v206_v25 = vld [vmem:[#allocation7 + $0xe0] sm:$0xff]  ;;  %v205_v29 = vld [vmem:[#allocation7 + $0xd8] sm:$0xff] }
  0x2f   :  { %113 = vmatprep.subr.mxu0 %v84_v9  ;;  %308 = vmatpush3.msra.mxu1 %v192_v19  ;;  %v74_v26 = vld [vmem:[#allocation5 + $0x68] sm:$0xff]  ;;  %v190_v27 = vld [vmem:[#allocation7 + $0x60] sm:$0xff]  ;;  %v72_v30 = vld [vmem:[#allocation5 + $0x58] sm:$0xff] }
  0x30   :  { %114 = vmatpush1.msra.mxu0 %v83_v10  ;;  %309 = vmatprep.subr.mxu1 %v207_v21  ;;  %v73_v28 = vld [vmem:[#allocation5 + $0x60] sm:$0xff]  ;;  %v189_v31 = vld [vmem:[#allocation7 + $0x58] sm:$0xff]  ;;  %v71_v32 = vld [vmem:[#allocation5 + $0x50] sm:$0xff] }
  0x31   :  { %115 = vmatprep.subr.mxu0 %v82_v11  ;;  %310 = vmatpush3.msra.mxu1 %v191_v23  ;;  %v204_v33 = vld [vmem:[#allocation7 + $0xd0] sm:$0xff]  ;;  %v70_v34 = vld [vmem:[#allocation5 + $0x48] sm:$0xff]  ;;  %v69_v36 = vld [vmem:[#allocation5 + $0x40] sm:$0xff] }
  0x32   :  { %116 = vmatpush1.msra.mxu0 %v81_v12  ;;  %311 = vmatprep.subr.mxu1 %v206_v25  ;;  %v188_v35 = vld [vmem:[#allocation7 + $0x50] sm:$0xff]  ;;  %v203_v37 = vld [vmem:[#allocation7 + $0xc8] sm:$0xff]  ;;  %v68_v38 = vld [vmem:[#allocation5 + $0x38] sm:$0xff] }
  0x33   :  { %117 = vmatprep.subr.mxu0 %v80_v13  ;;  %312 = vmatpush3.msra.mxu1 %v190_v27  ;;  %v187_v39 = vld [vmem:[#allocation7 + $0x48] sm:$0xff]  ;;  %v67_v40 = vld [vmem:[#allocation5 + $0x30] sm:$0xff]  ;;  %v202_v41 = vld [vmem:[#allocation7 + $0xc0] sm:$0xff] }
  0x34   :  { %118 = vmatpush1.msra.mxu0 %v79_v14  ;;  %313 = vmatprep.subr.mxu1 %v205_v29  ;;  %v66_v42 = vld [vmem:[#allocation5 + $0x28] sm:$0xff]  ;;  %v186_v43 = vld [vmem:[#allocation7 + $0x40] sm:$0xff]  ;;  %v201_v45 = vld [vmem:[#allocation7 + $0xb8] sm:$0xff] }
  0x35   :  { %119 = vmatprep.subr.mxu0 %v78_v18  ;;  %314 = vmatpush3.msra.mxu1 %v189_v31  ;;  %v65_v44 = vld [vmem:[#allocation5 + $0x20] sm:$0xff]  ;;  %v64_v46 = vld [vmem:[#allocation5 + $0x18] sm:$0xff]  ;;  %v63_v48 = vld [vmem:[#allocation5 + $0x10] sm:$0xff] }
  0x36   :  { %120 = vmatpush1.msra.mxu0 %v77_v20  ;;  %315 = vmatprep.subr.mxu1 %v204_v33  ;;  %v185_v47 = vld [vmem:[#allocation7 + $0x38] sm:$0xff]  ;;  %v200_v49 = vld [vmem:[#allocation7 + $0xb0] sm:$0xff]  ;;  %v62_v50 = vld [vmem:[#allocation5 + $0x8] sm:$0xff] }
  0x37   :  { %121 = vmatprep.subr.mxu0 %v76_v22  ;;  %316 = vmatpush3.msra.mxu1 %v188_v35  ;;  %v184_v51 = vld [vmem:[#allocation7 + $0x30] sm:$0xff]  ;;  %v61_v52 = vld [vmem:[#allocation5] sm:$0xff]  ;;  %v199_v53 = vld [vmem:[#allocation7 + $0xa8] sm:$0xff] }
  0x38   :  { %122 = vmatpush1.msra.mxu0 %v75_v24  ;;  %317 = vmatprep.subr.mxu1 %v203_v37  ;;  %v60_v54 = vld [vmem:[#allocation2] sm:$0xff]  ;;  %v183_v55 = vld [vmem:[#allocation7 + $0x28] sm:$0xff]  ;;  %v198_v56 = vld [vmem:[#allocation7 + $0xa0] sm:$0xff] }
  0x39   :  { %123 = vmatprep.subr.mxu0 %v74_v26  ;;  %318 = vmatpush3.msra.mxu1 %v187_v39  ;;  %v182_v57 = vld [vmem:[#allocation7 + $0x20] sm:$0xff]  ;;  %v197_v58 = vld [vmem:[#allocation7 + $0x98] sm:$0xff]  ;;  %v196_v60 = vld [vmem:[#allocation7 + $0x90] sm:$0xff] }
  0x3a   :  { %124 = vmatpush1.msra.mxu0 %v73_v28  ;;  %319 = vmatprep.subr.mxu1 %v202_v41  ;;  %v181_v59 = vld [vmem:[#allocation7 + $0x18] sm:$0xff]  ;;  %v180_v61 = vld [vmem:[#allocation7 + $0x10] sm:$0xff]  ;;  %v195_v62 = vld [vmem:[#allocation7 + $0x88] sm:$0xff] }
  0x3b   :  { %125 = vmatprep.subr.mxu0 %v72_v30  ;;  %320 = vmatpush3.msra.mxu1 %v186_v43  ;;  %v179_v63 = vld [vmem:[#allocation7 + $0x8] sm:$0xff]  ;;  %v194_v0 = vld [vmem:[#allocation7 + $0x80] sm:$0xff]  ;;  %v93_v5 = vld [vmem:[%s495_s3] sm:$0x3]  ;;  %s409_s3 = scalar_lea.vmem %s295_s14, 128 }
  0x3c   :  { %126 = vmatpush1.msra.mxu0 %v71_v32  ;;  %321 = vmatprep.subr.mxu1 %v201_v45  ;;  %v178_v1 = vld [vmem:[#allocation7] sm:$0xff]  ;;  %v98_v7 = vrot.slane %v93_v5, %v97_v4  ;;  %v102_v8 = vrot.slane %v93_v5, %v101_v6  ;;  %v304_v16 = vld [vmem:[%s496_s4] ss:$0 sm:$0xff]  ;;  %p410_p1 = scmp.ne.s32.totalorder %s295_s14, %s409_s3  ;;  %p415_p3 = scmp.lt.s32.totalorder %s409_s3, %s409_s3 }
  0x3d   :  { %127 = vmatprep.subr.mxu0 %v70_v34  ;;  %322 = vmatpush3.msra.mxu1 %v185_v47 }
  0x3e   :  { %128 = vmatpush1.msra.mxu0 %v69_v36  ;;  %323 = vmatprep.subr.mxu1 %v200_v49  ;;  %p416_p4 = por %p415_p3, %p414_p2 }
  0x3f   :  { %129 = vmatprep.subr.mxu0 %v68_v38  ;;  %324 = vmatpush3.msra.mxu1 %v184_v51 }
  0x40   :  { %130 = vmatpush1.msra.mxu0 %v67_v40  ;;  %325 = vmatprep.subr.mxu1 %v199_v53  ;;  %p417_p5 = pnand %p416_p4, %p410_p1 }
  0x41   :  { %131 = vmatprep.subr.mxu0 %v66_v42  ;;  %326 = vmatpush3.msra.mxu1 %v183_v55 }
  0x42   :  { %132 = vmatpush1.msra.mxu0 %v65_v44  ;;  %327 = vmatprep.subr.mxu1 %v198_v56 }
  0x43   :  { %133 = vmatprep.subr.mxu0 %v64_v46  ;;  %328 = vmatpush3.msra.mxu1 %v182_v57 }
  0x44   :  { %134 = vmatpush1.msra.mxu0 %v63_v48  ;;  %329 = vmatprep.subr.mxu1 %v197_v58 }
  0x45   :  { %135 = vmatprep.subr.mxu0 %v62_v50  ;;  %330 = vmatpush3.msra.mxu1 %v181_v59 }
  0x46   :  { %136 = vmatpush1.msra.mxu0 %v61_v52  ;;  %331 = vmatprep.subr.mxu1 %v196_v60 }
  0x47   :  { %170 = vmatmul.mubr.f32.vlgmr.msra.gmra.mxu0 %v60_v54  ;;  %332 = vmatpush3.msra.mxu1 %v180_v61 }
  0x48   :  { %333 = vmatprep.subr.mxu1 %v195_v62 }
  0x49   :  { %334 = vmatpush3.msra.mxu1 %v179_v63 }
  0x4a   :  { %335 = vmatprep.subr.mxu1 %v194_v0 }
  0x4b   :  { %336 = vmatpush3.msra.mxu1 %v178_v1 }
 0x107   :  { %v171_v9 = vpop.f32.mrf.mxu0 }
 0x108   :  { %v172_v10 = vadd.f32 %v171_v9, %v98_v7 }
 0x109   :  { %v173_v11 = vpop.f32.mrf.mxu0 }
 0x10a   :  { %v174_v12 = vadd.f32 %v173_v11, %v102_v8  ;;  %v176_v14 = vmax.f32 %v172_v10, 0.0 }
 0x10c   :  { %v177_v13 = vmax.f32 %v174_v12, 0.0 }
 0x10e   :  { %281 = vmatprep.mubr.f32.mxu1 %v177_v13 }
 0x10f   :  { %282 = vmatmul.mubr.f32.vlgmr.msra.gmra.mxu1 %v176_v14 }
 0x1cf   :  { %v337_v15 = vpop.f32.mrf.mxu1 }
 0x1d1   :  { %v338_v17 = vpop.f32.mrf.mxu1 }
 0x1d2   :  { %v339_v18 = vadd.f32 %v338_v17, %v337_v15 }
 0x1d4   :  { %v284_v19 = vadd.f32 %v339_v18, %v304_v16 }
 0x1d6   :  { %287 = vst [vmem:[#allocation8] sm:$0xff] %v284_v19 }
 0x1d7   :  { %420 = shalt.err (!%p417_p5)
}
 0x1d8   :  { %297 = dma.vmem_to_hbm [thread:$0]  %s295_s14, 128, %s497_s5, [#allocation4]  }
 0x1d9   :  { %433 = dma.done.wait [#allocation4], 128  }
 0x1da   :  { %434 = vsyncadd [#allocation4], 4294967168 }
 0x1db   :  { %301 = vsyncpa [#allocation3], 1 }
 0x1dc   :  { %302 = vsyncpa [#allocation6], 1 }
 0x1dd   :  { %303 = vsyncpa [#allocation4], 1 }

</bundles_post_ra>
